<compile_context>
chip_gen: v6e
topology: v6e:2x2x1
jax: 0.10.0
libtpu: 0.0.40
codegen_flags: <defaults>
</compile_context>

<pallas_src>
import functools
import numpy as np

import jax
import jax.numpy as jnp
from jax.experimental import pallas as pl
from jax.experimental.pallas import tpu as pltpu


def _round_up(x, m):
    return ((x + m - 1) // m) * m


# --------------------------- hardware-aware sizing ---------------------------


@functools.lru_cache(maxsize=None)
def _hw_params():
    """Returns (vmem_limit_bytes, tile_budget_bytes), generation-aware.

    v5e/v6e have 128 MiB physical VMEM -> 64 MiB scoped limit and bigger
    tiles; v7x has 64 MiB physical -> stay at 40 MiB scoped. The tile byte
    budget is ~half the scoped limit and is split by the per-element VMEM
    footprint (double-buffered in+out + f32 temporaries) in the wrappers.
    """
    cap = None
    try:
        fn = getattr(pltpu, "get_tpu_info", None)
        if fn is not None:
            cap = int(fn().vmem_capacity_bytes)
    except Exception:
        cap = None
    if cap is None:
        cap = 64 * 1024 * 1024  # conservative default: assume v7x-sized VMEM
    vmem_limit = 64 * 1024 * 1024 if cap >= 100 * 1024 * 1024 else 40 * 1024 * 1024
    return vmem_limit, vmem_limit // 2


def _per_elem_vmem_bytes(itemsize):
    # double-buffered input + double-buffered output + ~3 f32 in-kernel temps.
    return 4 * itemsize + 3 * 4


def _pick_tile(total, budget_elems, granule, min_steps):
    """Tile length along an independent (non-reduced) axis.

    Multiple of `granule`, sized from the VMEM element budget, capped so the
    grid has >= min_steps steps when possible (pipeline overlap + both v7x
    cores busy).  Returns (tile, num_blocks).  If the whole axis fits in one
    tile we use the exact extent (always layout-legal); otherwise the tile is
    a multiple of `granule` and the ragged boundary block is handled by
    Pallas' partial-block masking — no host-side pad/slice passes.
    """
    t = max(granule, (budget_elems // granule) * granule)
    cap = max(granule, _round_up(pl.cdiv(total, min_steps), granule))
    t = min(t, cap)
    if t >= total:
        return total, 1
    return t, pl.cdiv(total, t)


# --------------------------------- kernels -----------------------------------


def _ln_lane_kernel(x_ref, w_ref, b_ref, o_ref, *, eps, inv_c):
    """Normalize over the (full) last/lane axis.  x: (TR, C), w/b: (1, C)."""
    x = x_ref[...].astype(jnp.float32)
    mean = jnp.sum(x, axis=-1, keepdims=True) * inv_c
    d = x - mean                       # centered form: no E[x^2]-mean^2 cancellation
    var = jnp.sum(d * d, axis=-1, keepdims=True) * inv_c
    inv = jax.lax.rsqrt(var + eps)
    y = d * inv * w_ref[...].astype(jnp.float32) + b_ref[...].astype(jnp.float32)
    o_ref[...] = y.astype(o_ref.dtype)


def _ln_lane_segmented_kernel(x_ref, w_ref, b_ref, bd_ref, o_ref, *, eps, inv_c):
    """Small-C channels_last: `fold` independent rows packed along the lane
    axis (lane = fold*C = 128).  Per-segment sum + broadcast-back is a matmul
    against a block-diagonal ones matrix -> otherwise-idle MXU, lane-dense
    (unmasked) loads/stores."""
    x = x_ref[...].astype(jnp.float32)                  # (TR, fold*C)
    bd = bd_ref[...]                                    # (fold*C, fold*C) block-diag ones
    mean = jnp.dot(x, bd, preferred_element_type=jnp.float32,
                   precision=jax.lax.Precision.HIGHEST) * inv_c
    d = x - mean
    var = jnp.dot(d * d, bd, preferred_element_type=jnp.float32,
                  precision=jax.lax.Precision.HIGHEST) * inv_c
    inv = jax.lax.rsqrt(var + eps)
    y = d * inv * w_ref[...].astype(jnp.float32) + b_ref[...].astype(jnp.float32)
    o_ref[...] = y.astype(o_ref.dtype)


def _ln_sublane_kernel(x_ref, w_ref, b_ref, o_ref, *, eps, inv_c):
    """channels_first, transpose-free: normalize over the channel (sublane)
    axis, flattened spatial axis lane-dense.  x: (1, C, THW), w/b: (1, C, 1)."""
    x = x_ref[...].astype(jnp.float32)
    mean = jnp.sum(x, axis=1, keepdims=True) * inv_c
    d = x - mean
    var = jnp.sum(d * d, axis=1, keepdims=True) * inv_c
    inv = jax.lax.rsqrt(var + eps)
    y = d * inv * w_ref[...].astype(jnp.float32) + b_ref[...].astype(jnp.float32)
    o_ref[...] = y.astype(o_ref.dtype)


# -------------------------------- wrappers -----------------------------------


def _layer_norm_channels_last_2d(x2d, weight, bias, eps):
    rows, C = x2d.shape
    itemsize = jnp.dtype(x2d.dtype).itemsize
    vmem_limit, tile_budget = _hw_params()

    # Small-C lane folding: pack fold = 128//C contiguous rows into one
    # 128-lane-wide folded row ((rows, C) is row-major so this is a free view).
    fold = 1
    if C < 128 and 128 % C == 0:
        f = 128 // C
        if rows >= f and rows % f == 0:
            fold = f

    lane = fold * C
    rows_f = rows // fold
    x_f = x2d.reshape(rows_f, lane)
    if fold > 1:
        w_row = jnp.tile(weight.reshape(-1), fold).reshape(1, lane)
        b_row = jnp.tile(bias.reshape(-1), fold).reshape(1, lane)
    else:
        w_row = weight.reshape(1, lane)
        b_row = bias.reshape(1, lane)

    row_budget = max(1, tile_budget // max(1, lane * _per_elem_vmem_bytes(itemsize)))
    tr, n_r = _pick_tile(rows_f, row_budget, 8, 8)
    # TODO(synk): for extremely large C (a single (8, lane) tile blowing past
    # the VMEM budget) fall back to tiling C across a grid axis with s1/s2
    # scratch accumulators + pl.when finalize instead of forcing tr=8.

    inv_c = 1.0 / C
    if fold == 1:
        kernel = functools.partial(_ln_lane_kernel, eps=float(eps), inv_c=inv_c)
        in_specs = [
            pl.BlockSpec((tr, lane), lambda i: (i, 0)),
            pl.BlockSpec((1, lane), lambda i: (0, 0)),
            pl.BlockSpec((1, lane), lambda i: (0, 0)),
        ]
        args = (x_f, w_row, b_row)
    else:
        seg = jnp.arange(lane, dtype=jnp.int32) // C
        bd = (seg[:, None] == seg[None, :]).astype(jnp.float32)
        kernel = functools.partial(_ln_lane_segmented_kernel, eps=float(eps), inv_c=inv_c)
        in_specs = [
            pl.BlockSpec((tr, lane), lambda i: (i, 0)),
            pl.BlockSpec((1, lane), lambda i: (0, 0)),
            pl.BlockSpec((1, lane), lambda i: (0, 0)),
            pl.BlockSpec((lane, lane), lambda i: (0, 0)),
        ]
        args = (x_f, w_row, b_row, bd)

    out = pl.pallas_call(
        kernel,
        out_shape=jax.ShapeDtypeStruct((rows_f, lane), x2d.dtype),
        grid_spec=pltpu.PrefetchScalarGridSpec(
            num_scalar_prefetch=0,
            grid=(n_r,),
            in_specs=in_specs,
            out_specs=pl.BlockSpec((tr, lane), lambda i: (i, 0)),
        ),
        compiler_params=pltpu.CompilerParams(
            dimension_semantics=("parallel",),
            vmem_limit_bytes=vmem_limit,
        ),
    )(*args)

    return out.reshape(rows, C)


def _layer_norm_channels_first(x, weight, bias, eps):
    """x: (B, C, *spatial).  Normalize over C with NO transposes: C on
    sublanes, flattened spatial axis lane-dense."""
    B, C = x.shape[0], x.shape[1]
    spatial = x.shape[2:]
    hw = int(np.prod(spatial)) if spatial else 1
    x3 = x.reshape(B, C, hw)

    itemsize = jnp.dtype(x.dtype).itemsize
    vmem_limit, tile_budget = _hw_params()

    # (C, THW) tiles are sublane-padded in VMEM (C=4 f32 -> 8 sublanes, bf16 ->
    # 16); account for that padding in the byte budget so we never over-commit.
    c_pad = _round_up(C, max(8, 32 // itemsize))
    thw_budget = max(1, tile_budget // max(1, c_pad * _per_elem_vmem_bytes(itemsize)))
    thw, n_hw = _pick_tile(hw, thw_budget, 128, pl.cdiv(8, max(1, B)))
    # TODO(synk): for tiny C also fold 8//C batches into the sublane axis
    # ((B*C, HW) view + block-diagonal segmented sums) for full vreg/VMEM use.

    out = pl.pallas_call(
        functools.partial(_ln_sublane_kernel, eps=float(eps), inv_c=1.0 / C),
        out_shape=jax.ShapeDtypeStruct((B, C, hw), x.dtype),
        grid_spec=pltpu.PrefetchScalarGridSpec(
            num_scalar_prefetch=0,
            grid=(B, n_hw),
            in_specs=[
                pl.BlockSpec((1, C, thw), lambda b, j: (b, 0, j)),
                pl.BlockSpec((1, C, 1), lambda b, j: (0, 0, 0)),
                pl.BlockSpec((1, C, 1), lambda b, j: (0, 0, 0)),
            ],
            out_specs=pl.BlockSpec((1, C, thw), lambda b, j: (b, 0, j)),
        ),
        compiler_params=pltpu.CompilerParams(
            dimension_semantics=("parallel", "parallel"),
            vmem_limit_bytes=vmem_limit,
        ),
    )(x3, weight.reshape(1, C, 1), bias.reshape(1, C, 1))

    return out.reshape(x.shape)


def layer_norm(x, weight, bias, eps=1e-6, data_format="channels_last"):
    """Matches the PyTorch LayerNorm module's forward for both data formats."""
    if data_format not in ("channels_last", "channels_first"):
        raise NotImplementedError(data_format)
    if data_format == "channels_first":
        return _layer_norm_channels_first(x, weight, bias, eps)
    orig_shape = x.shape
    C = orig_shape[-1]
    rows = int(np.prod(orig_shape[:-1])) if len(orig_shape) > 1 else 1
    y2d = _layer_norm_channels_last_2d(x.reshape(rows, C), weight, bias, eps)
    return y2d.reshape(orig_shape)


# ----------------------------- reference & test ------------------------------


def _reference_layer_norm(x, weight, bias, eps, data_format):
    if data_format == "channels_last":
        u = jnp.mean(x, axis=-1, keepdims=True)
        s = jnp.mean((x - u) ** 2, axis=-1, keepdims=True)
        xn = (x - u) / jnp.sqrt(s + eps)
        return xn * weight + bias
    else:  # channels_first
        u = jnp.mean(x, axis=1, keepdims=True)
        s = jnp.mean((x - u) ** 2, axis=1, keepdims=True)
        xn = (x - u) / jnp.sqrt(s + eps)
        return weight[None, :, None, None] * xn + bias[None, :, None, None]


def _check(y, ref):
    # Centered two-pass variance matches the reference formulation closely ->
    # tolerance can be tight (f32 rounding + rsqrt only).
    np.testing.assert_allclose(np.asarray(y), np.asarray(ref), atol=2e-5, rtol=2e-5)


if __name__ == "__main__":
    key = jax.random.PRNGKey(0)
    k1, k2, k3, k4, k5, k6 = jax.random.split(key, 6)
    eps = 1e-6

    # --- channels_first: (B, C, H, W), normalized over C (sublane kernel) ----
    B, C, H, W = 2, 4, 16, 16
    x_cf = jax.random.normal(k1, (B, C, H, W), dtype=jnp.float32)
    w_cf = 1.0 + 0.1 * jax.random.normal(k3, (C,), dtype=jnp.float32)
    b_cf = 0.1 * jax.random.normal(k4, (C,), dtype=jnp.float32)
    y_cf = jax.block_until_ready(
        layer_norm(x_cf, w_cf, b_cf, eps=eps, data_format="channels_first"))
    assert y_cf.shape == (B, C, H, W)
    _check(y_cf, _reference_layer_norm(x_cf, w_cf, b_cf, eps, "channels_first"))

    # --- channels_last: (B, H, W, C2), normalized over C2 (lane-folded) ------
    C2 = 32
    x_cl = jax.random.normal(k2, (B, H, W, C2), dtype=jnp.float32)
    w_cl = 1.0 + 0.1 * jax.random.normal(k5, (C2,), dtype=jnp.float32)
    b_cl = 0.1 * jax.random.normal(k6, (C2,), dtype=jnp.float32)
    y_cl = jax.block_until_ready(
        layer_norm(x_cl, w_cl, b_cl, eps=eps, data_format="channels_last"))
    assert y_cl.shape == (B, H, W, C2)
    _check(y_cl, _reference_layer_norm(x_cl, w_cl, b_cl, eps, "channels_last"))

    # --- ragged shapes: partial boundary blocks, no host-side pad/slice ------
    x_cl2 = jax.random.normal(k1, (2, 5, 7, C2), dtype=jnp.float32)   # rows = 70
    y_cl2 = jax.block_until_ready(
        layer_norm(x_cl2, w_cl, b_cl, eps=eps, data_format="channels_last"))
    _check(y_cl2, _reference_layer_norm(x_cl2, w_cl, b_cl, eps, "channels_last"))

    x_cf2 = jax.random.normal(k2, (2, C, 5, 7), dtype=jnp.float32)    # HW = 35
    y_cf2 = jax.block_until_ready(
        layer_norm(x_cf2, w_cf, b_cf, eps=eps, data_format="channels_first"))
    _check(y_cf2, _reference_layer_norm(x_cf2, w_cf, b_cf, eps, "channels_first"))

    print("KERNEL_OK")
</pallas_src>

<mosaic_0001>
module attributes {stable_mosaic.version = 11 : i64} {
  func.func @_ln_sublane_kernel(%arg0: i32, %arg1: i32, %arg2: memref<1x4x128xf32, #tpu.memory_space<vmem>>, %arg3: memref<1x4x1xf32, #tpu.memory_space<vmem>>, %arg4: memref<1x4x1xf32, #tpu.memory_space<vmem>>, %arg5: memref<1x4x128xf32, #tpu.memory_space<vmem>>) attributes {dimension_semantics = [#tpu.dimension_semantics<parallel>, #tpu.dimension_semantics<parallel>], iteration_bounds = array<i64: 2, 2>, scalar_prefetch = 0 : i64, scratch_operands = 0 : i64, tpu.core_type = #tpu.core_type<tc>, window_params = [{transform_indices = @transform_0, window_bounds = array<i64: 1, 4, 128>}, {pipeline_mode = #tpu.pipeline_mode<synchronous>, transform_indices = @transform_1, window_bounds = array<i64: 1, 4, 1>}, {pipeline_mode = #tpu.pipeline_mode<synchronous>, transform_indices = @transform_2, window_bounds = array<i64: 1, 4, 1>}, {transform_indices = @transform_3, window_bounds = array<i64: 1, 4, 128>}]} {
    %c0 = arith.constant 0 : index
    %c0_0 = arith.constant 0 : index
    %c0_1 = arith.constant 0 : index
    %0 = vector.load %arg2[%c0, %c0_0, %c0_1] : memref<1x4x128xf32, #tpu.memory_space<vmem>>, vector<1x4x128xf32>
    %cst = arith.constant dense<0.000000e+00> : vector<1x128xf32>
    %1 = vector.multi_reduction <add>, %0, %cst [1] : vector<1x4x128xf32> to vector<1x128xf32>
    %2 = vector.shape_cast %1 : vector<1x128xf32> to vector<1x1x128xf32>
    %cst_2 = arith.constant 2.500000e-01 : f32
    %3 = vector.broadcast %cst_2 : f32 to vector<1x1x128xf32>
    %4 = arith.mulf %2, %3 : vector<1x1x128xf32>
    %5 = vector.broadcast %4 : vector<1x1x128xf32> to vector<1x4x128xf32>
    %6 = arith.subf %0, %5 : vector<1x4x128xf32>
    %7 = arith.mulf %6, %6 : vector<1x4x128xf32>
    %cst_3 = arith.constant dense<0.000000e+00> : vector<1x128xf32>
    %8 = vector.multi_reduction <add>, %7, %cst_3 [1] : vector<1x4x128xf32> to vector<1x128xf32>
    %9 = vector.shape_cast %8 : vector<1x128xf32> to vector<1x1x128xf32>
    %cst_4 = arith.constant 2.500000e-01 : f32
    %10 = vector.broadcast %cst_4 : f32 to vector<1x1x128xf32>
    %11 = arith.mulf %9, %10 : vector<1x1x128xf32>
    %cst_5 = arith.constant 9.99999997E-7 : f32
    %12 = vector.broadcast %cst_5 : f32 to vector<1x1x128xf32>
    %13 = arith.addf %11, %12 : vector<1x1x128xf32>
    %14 = math.rsqrt %13 : vector<1x1x128xf32>
    %15 = vector.broadcast %14 : vector<1x1x128xf32> to vector<1x4x128xf32>
    %16 = arith.mulf %6, %15 : vector<1x4x128xf32>
    %c0_6 = arith.constant 0 : index
    %c0_7 = arith.constant 0 : index
    %c0_8 = arith.constant 0 : index
    %17 = vector.load %arg3[%c0_6, %c0_7, %c0_8] : memref<1x4x1xf32, #tpu.memory_space<vmem>>, vector<1x4x1xf32>
    %18 = vector.broadcast %17 : vector<1x4x1xf32> to vector<1x4x128xf32>
    %19 = arith.mulf %16, %18 : vector<1x4x128xf32>
    %c0_9 = arith.constant 0 : index
    %c0_10 = arith.constant 0 : index
    %c0_11 = arith.constant 0 : index
    %20 = vector.load %arg4[%c0_9, %c0_10, %c0_11] : memref<1x4x1xf32, #tpu.memory_space<vmem>>, vector<1x4x1xf32>
    %21 = vector.broadcast %20 : vector<1x4x1xf32> to vector<1x4x128xf32>
    %22 = arith.addf %19, %21 : vector<1x4x128xf32>
    %c0_12 = arith.constant 0 : index
    %c0_13 = arith.constant 0 : index
    %c0_14 = arith.constant 0 : index
    %23 = vector.load %arg5[%c0_12, %c0_13, %c0_14] : memref<1x4x128xf32, #tpu.memory_space<vmem>>, vector<1x4x128xf32>
    tpu.vector_store %arg5[%c0_12, %c0_13, %c0_14], %22 {strides = array<i32>} : memref<1x4x128xf32, #tpu.memory_space<vmem>>, vector<1x4x128xf32>,
    return
  }
  func.func @transform_0(%arg0: i32, %arg1: i32) -> (i32, i32, i32) {
    %c0_i32 = arith.constant 0 : i32
    %c0_i32_0 = arith.constant 0 : i32
    return %arg0, %c0_i32, %arg1 : i32, i32, i32
  }
  func.func @transform_1(%arg0: i32, %arg1: i32) -> (i32, i32, i32) {
    %c0_i32 = arith.constant 0 : i32
    %c0_i32_0 = arith.constant 0 : i32
    %c0_i32_1 = arith.constant 0 : i32
    %c0_i32_2 = arith.constant 0 : i32
    return %c0_i32, %c0_i32_0, %c0_i32_1 : i32, i32, i32
  }
  func.func @transform_2(%arg0: i32, %arg1: i32) -> (i32, i32, i32) {
    %c0_i32 = arith.constant 0 : i32
    %c0_i32_0 = arith.constant 0 : i32
    %c0_i32_1 = arith.constant 0 : i32
    %c0_i32_2 = arith.constant 0 : i32
    return %c0_i32, %c0_i32_0, %c0_i32_1 : i32, i32, i32
  }
  func.func @transform_3(%arg0: i32, %arg1: i32) -> (i32, i32, i32) {
    %c0_i32 = arith.constant 0 : i32
    %c0_i32_0 = arith.constant 0 : i32
    return %arg0, %c0_i32, %arg1 : i32, i32, i32
  }
}

</mosaic_0001>

<bundles_post_ra>
// kernel: tpu_custom_call.1
= control target key start
LH: loop header
LB: loop body
LE: loop exit
PB: predicated region body
PF: predicated region fallthrough
CT: control target
= control target key end

     0   :  { %8 = vsyncpa [#allocation3], 0  ;;  %s755_s0 = inlined_call_operand.hbm [shape: f32[2,4,256], index: 0, kind: input, shape index: {}]   ;;  %s756_s1 = inlined_call_operand.vmem [shape: f32[1,4,1], index: 1, kind: input, shape index: {}]   ;;  %s757_s2 = inlined_call_operand.vmem [shape: f32[1,4,1], index: 2, kind: input, shape index: {}]   ;;  %s758_s3 = inlined_call_operand.hbm [shape: f32[2,4,256], index: 3, kind: output, shape index: {}]  }
   0x1   :  { %10 = vsyncpa [#allocation3 + $0x1], 0 }
   0x2   :  { %11 = vsyncpa [#allocation4], 0 }
   0x3   :  { %13 = vsyncpa [#allocation4 + $0x1], 0  ;;  %s589_s12 = smov 0   ;;  %s591_s13 = smov 0  }
   0x4   :  { %s593_s14 = smov 0   ;;  %s595_s15 = smov 0  }
   0x5   :  { %s597_s16 = smov 0   ;;  %s599_s17 = smov 0  }
   0x6   :  { %s601_s18 = smov 0   ;;  %s603_s19 = smov 0  }
   0x7 LB: > { %s343_s20 = sadd.s32 4294967295, %s564_s19   ;;  %s344_s21 = sadd.s32 4294967294, %s564_s19   ;;  %s564_s19 = sphi %s603_s19, %s19_s19   ;;  %s560_s18 = sphi %s601_s18, %s774_s18   ;;  %s556_s17 = sphi %s599_s17, %s773_s17   ;;  %s552_s16 = sphi %s597_s16, %s772_s16   ;;  %s548_s15 = sphi %s595_s15, %s771_s15   ;;  %s544_s14 = sphi %s593_s14, %s770_s14   ;;  %s540_s13 = sphi %s591_s13, %s769_s13   ;;  %s536_s12 = sphi %s589_s12, %s768_s12  }
   0x8   : > { %s28_s22 = sadd.s32 1, %s556_s17  ;;  %s31_s23 = sadd.s32 1, %s560_s18 }
   0x9   : > { %p29_p0 = scmp.ge.s32.totalorder %s28_s22, 2  ;;  %s40_s24 = sadd.s32 1, %s544_s14 }
   0xa   : > { %p47_p1 = scmp.ne.s32.totalorder %s544_s14, %s540_s13  ;;  %p48_p2 = scmp.eq.s32.totalorder %s564_s19, 0 }
   0xb   : > { %s776_s22 = smov (%p29_p0, %s28_s22), 0  ;;  %s778_s23 = smov (!%p29_p0, %s31_s23), %s560_s18 }
   0xc   : > { %s36_s25 = ssub.s32 %s556_s17, %s776_s22  ;;  %p642_p3 = por %p48_p2, %p47_p1 }
   0xd   : > { %p33_p4 = scmp.ge.s32.totalorder %s778_s23, 2  ;;  %p53_p5 = scmp.ne.s32.totalorder %s540_s13, %s536_s12 }
   0xe   : > { %p54_p6 = scmp.eq.s32.totalorder %s343_s20, 0  ;;  %p121_p7 = scmp.eq.s32.totalorder %s343_s20, 3 }
   0xf   : > { %s780_s23 = smov (%p33_p4, %s778_s23), 0  ;;  %p127_p10 = scmp.eq.s32.totalorder %s344_s21, 3 }
  0x10   : > { %761 = sst [smem:[#allocation8_spill]] %s780_s23  ;;  %p650_p8 = por %p54_p6, %p53_p5 }
  0x11   : > { %p654_p9 = por %p121_p7, %p47_p1  ;;  %s35_s29 = ssub.s32 %s560_s18, %s780_s23 }
  0x12   : > { %s37_s30 = sor.u32 %s36_s25, %s35_s29  ;;  %p660_p12 = por %p127_p10, %p53_p5 }
  0x13   : > { %p38_p11 = scmp.eq.s32.totalorder %s37_s30, 0  ;;  %p370_p13 = scmp.lt.s32.totalorder %s564_s19, 4 }
  0x14   : > { %s764_s4 = scalar_select %p660_p12, 1, 0 }
  0x15   : > { %s153_s5 = sand.u32 1, %s544_s14   ;;  %s348_s8 = sshll.u32 %s560_s18, 1 }
  0x16   : > { %s667_s6 = scalar_select %p38_p11, %s544_s14, %s40_s24  }
  0x17   : > { %s347_s7 = sshll.u32 %s153_s5, 2  ;;  %s162_s9 = sadd.s32 %s556_s17, %s348_s8 }
  0x18   : > { %s157_s10 = scalar_lea.vmem [#allocation2], %s347_s7  ;;  %s349_s20 = sshll.u32 %s162_s9, 6 }
  0x19   : > { %s166_s11 = sshll.u32 %s157_s10, 4  ;;  %s164_s25 = scalar_lea.hbm %s755_s0, %s349_s20  ;;  %s167_s11 = int_to_ptr.vmem [resolvable:$true] %s166_s11 }
  0x1a   : > { %p676_p0 = pnand %p370_p13, %p642_p3  ;;  %p350_p1 = scmp.ge.s32.totalorder %s564_s19, 1 }
  0x1b   : > { %p171_p2 = scmp.lt.s32.totalorder %s564_s19, 5  ;;  %s154_s24 = scalar_lea.sflag [#allocation3], %s153_s5 }
  0x1c   : > { %p442_p4 = pneg %p676_p0  ;;  %s453_s30 = scalar_lea.vmem %s167_s11, 64 }
  0x1d   : > { %p454_p5 = scmp.ne.s32.totalorder %s167_s11, %s453_s30  ;;  %s566_s7 = smov [#allocation2]  }
  0x1e   : > { %s458_s8 = sshll.u32 %s566_s7, 4  ;;  %s459_s8 = int_to_ptr.vmem [resolvable:$false] %s458_s8 }
  0x1f   : > { %p456_p6 = pnand %p454_p5, %p442_p4  ;;  %s460_s23 = scalar_lea.vmem %s459_s8, 128 }
  0x20   : > { %p461_p10 = scmp.lt.s32.totalorder %s167_s11, %s459_s8  ;;  %p462_p11 = scmp.lt.s32.totalorder %s460_s23, %s453_s30 }
  0x21   : > { %p457_p7 = pneg %p456_p6 }
  0x22   : > { %p463_p3 = por %p462_p11, %p461_p10 }
  0x24   : > { %p464_p13 = pnand %p463_p3, %p457_p7 }
  0x26   : > { %467 = shalt.err (!%p464_p13)
}
  0x27   : > { %365 = dma.hbm_to_vmem [thread:$0]  (!%p676_p0), %s164_s25, 64, %s167_s11, %s154_s24  }
  0x28   : > { %p172_p12 = pnand %p350_p1, %p171_p2 }
  0x29   : > { %s691_s26 = sand.u32 (!%p172_p12), 1, %s540_s13  }
  0x2a   : > { %175 = sbr.rel (%p172_p12) target bundleno = 193 (0xc1), region = 32  ;;  %s351_s5 = sshll.u32 (!%p172_p12), %s691_s26, 2 }
  0x2b   : > { %s178_s9 = scalar_lea.sflag (!%p172_p12), [#allocation3], %s691_s26  ;;  %s181_s10 = scalar_lea.vmem (!%p172_p12), [#allocation2], %s351_s5 }
  0x2f   : > { %527 = dma.done.wait (%p650_p8), %s178_s9, 64  }
  0x30   : > { %529 = vsyncadd (%p650_p8), %s178_s9, 4294967232  ;;  %v567_v0 = vmov 0   ;;  %v227_v1 = vld [vmem:[%s756_s1] sm:$0xf]  ;;  %vm205_vm0 = vcmask 1043456   ;;  %s354_s27 = sshll.u32 %s552_s16, 1 }
  0x31   : > { %437 = vset.pattern.permute.xlu0 %v567_v0  ;;  %v234_v2 = vld [vmem:[%s757_s2] sm:$0xf]  ;;  %s254_s29 = sadd.s32 %s548_s15, %s354_s27  ;;  %s203_s30 = scalar_lea.vmem [#allocation5], %s351_s5 }
  0x32   : > { %230 = vperm.xlu0 %437, %v227_v1   ;;  %v204_v3 = vld [vmem:[%s181_s10] sm:$0xf]  ;;  %s355_s24 = sshll.u32 %s254_s29, 6  ;;  %s258_s7 = sshll.u32 %s203_s30, 4  ;;  %s259_s7 = int_to_ptr.vmem [resolvable:$true] %s258_s7 }
  0x33   : > { %v206_v4 = vsel %vm205_vm0, %v204_v3, 0.0  ;;  %s256_s9 = scalar_lea.hbm %s758_s3, %s355_s24  ;;  %s243_s10 = scalar_lea.sflag [#allocation4], %s691_s26 }
  0x34   : > { %v207_v5 = vrot.slane %v206_v4, 4  ;;  %s468_s11 = scalar_lea.vmem %s259_s7, 64  ;;  %s568_s15 = smov [#allocation5]  }
  0x35   : > { %p469_p8 = scmp.ne.s32.totalorder %s259_s7, %s468_s11  ;;  %s472_s16 = sshll.u32 %s568_s15, 4  ;;  %s473_s16 = int_to_ptr.vmem [resolvable:$false] %s472_s16 }
  0x36   : > { %237 = vperm.xlu0 %437, %v234_v2   ;;  %v208_v6 = vadd.f32 %v207_v5, %v206_v4  ;;  %s474_s5 = scalar_lea.vmem %s473_s16, 128  ;;  %p475_p1 = scmp.lt.s32.totalorder %s259_s7, %s473_s16 }
  0x37   : > { %p470_p12 = pnand %p469_p8, %p654_p9  ;;  %p476_p2 = scmp.lt.s32.totalorder %s474_s5, %s468_s11 }
  0x38   : > { %v209_v7 = vrot.slane %v208_v6, 2 }
  0x39   : > { %p471_p0 = pneg %p470_p12  ;;  %p477_p4 = por %p476_p2, %p475_p1 }
  0x3a   : > { %v210_v8 = vadd.f32 %v209_v7, %v208_v6 }
  0x3b   : > { %p478_p5 = pnand %p477_p4, %p471_p0 }
  0x3c   : > { %v211_v9 = vrot.slane %v210_v8, 1 }
  0x3e   : > { %v212_v10 = vadd.f32 %v211_v9, %v210_v8 }
  0x40   : > { %v213_v11 = vmul.f32 0.25, %v212_v10 }
  0x42   : > { %v214_v12 = vsub.f32 %v204_v3, %v213_v11 }
  0x44   : > { %v215_v13 = vmul.f32 %v214_v12, %v214_v12 }
  0x46   : > { %v216_v14 = vsel %vm205_vm0, %v215_v13, 0.0 }
  0x47   : > { %v217_v15 = vrot.slane %v216_v14, 4 }
  0x49   : > { %v218_v16 = vadd.f32 %v217_v15, %v216_v14 }
  0x4b   : > { %v219_v17 = vrot.slane %v218_v16, 2 }
  0x4d   : > { %v220_v18 = vadd.f32 %v219_v17, %v218_v16 }
  0x4f   : > { %v221_v19 = vrot.slane %v220_v18, 1 }
  0x51   : > { %v222_v20 = vadd.f32 %v221_v19, %v220_v18 }
  0x53   : > { %v223_v21 = vmul.f32 0.25, %v222_v20 }
  0x55   : > { %v224_v22 = vadd.f32 1e-06, %v223_v21 }
  0x57   : > { %438 = vrsqrt.f32 %v224_v22 }
  0x64   : > { %v439_v23 = vpop.eup %438 }
  0x65   : > { %v226_v24 = vmul.f32 %v439_v23, %v214_v12 }
  0xad   : > { %v231_v25 = vpop.permute.xlu0 %230 }
  0xae   : > { %v233_v26 = vmul.f32 %v231_v25, %v226_v24 }
  0xb1   : > { %v238_v27 = vpop.permute.xlu0 %237 }
  0xb2   : > { %v240_v28 = vadd.f32 %v238_v27, %v233_v26 }
  0xb4   : > { %241 = vst [vmem:[%s203_s30] sm:$0xf] %v240_v28 }
  0xb5   : > { %481 = shalt.err (!%p478_p5)
}
  0xb6   : > { %s482_s20 = scalar_lea.hbm %s256_s9, 64  ;;  %s486_s25 = scalar_lea.hbm %s758_s3, 256 }
  0xb7   : > { %p483_p6 = scmp.ne.s32.totalorder %s256_s9, %s482_s20  ;;  %p487_p11 = scmp.lt.s32.totalorder %s256_s9, %s758_s3 }
  0xb8   : > { %p488_p3 = scmp.lt.s32.totalorder %s486_s25, %s482_s20 }
  0xb9   : > { %p484_p7 = pnand %p483_p6, %p654_p9 }
  0xba   : > { %p489_p13 = por %p488_p3, %p487_p11 }
  0xbb   : > { %p485_p10 = pneg %p484_p7 }
  0xbd   : > { %p490_p8 = pnand %p489_p13, %p485_p10 }
  0xbf   : > { %493 = shalt.err (!%p490_p8)
}
  0xc0   : > { %360 = dma.vmem_to_hbm [thread:$0]  (%p654_p9), %s259_s7, 64, %s256_s9, %s243_s10  }
  0xc1 PF: > { %p371_p12 = scmp.ge.s32.totalorder %s564_s19, 2  ;;  %s270_s24 = sand.u32 1, %s536_s12  }
  0xc2   : > { %p766_p0 = scmp.ne.s32.totalorder %s764_s4, 0  ;;  %s271_s30 = scalar_lea.sflag [#allocation4], %s270_s24 }
  0xc4   : > { %p367_p1 = pnand %p371_p12, %p766_p0 }
  0xc6   : > { %p368_p2 = pneg %p367_p1 }
  0xc8   : > { %531 = dma.done.wait (%p368_p2), %s271_s30, 64  }
  0xc9   : > { %533 = vsyncadd (%p368_p2), %s271_s30, 4294967232  ;;  %s19_s19 = sadd.s32 1, %s564_s19   ;;  %s767_s28 = sld [smem:[#allocation8_spill]] }
  0xca   : > { %p16_p4 = scmp.ge.s32.totalorder %s19_s19, 6   ;;  %s768_s12 = smov %s540_s13 }
  0xcb   : > { %s769_s13 = smov %s544_s14  ;;  %s770_s14 = smov %s667_s6 }
  0xcc   : > { %s771_s15 = smov %s556_s17  ;;  %s772_s16 = smov %s560_s18 }
  0xcd   : > { %s773_s17 = smov %s776_s22  ;;  %18 = sbr.rel (!%p16_p4) target bundleno = 7 (0x7), region = 77 }
  0xcf   : > { %s774_s18 = smov %s767_s28 }
  0xd2   :  { %276 = vsyncpa [#allocation3], 1 }
  0xd3   :  { %278 = vsyncpa [#allocation3 + $0x1], 1 }
  0xd4   :  { %279 = vsyncpa [#allocation4], 1 }
  0xd5   :  { %281 = vsyncpa [#allocation4 + $0x1], 1 }

</bundles_post_ra>
